<compile_context>
chip_gen: v5e
topology: v5e:2x2
jax: 0.10.0
libtpu: 0.0.40
codegen_flags: <defaults>
</compile_context>

<pallas_src>
import functools

import jax
import jax.numpy as jnp
from jax.experimental import pallas as pl
from jax.experimental.pallas import tpu as pltpu


def _round_up(x: int, m: int) -> int:
    return ((x + m - 1) // m) * m


def _cdiv(a: int, b: int) -> int:
    return -(-a // b)


# ---------------------------------------------------------------------------
# Kernel body: one (TB, *) batch tile of tanh(relu(relu(x@W1+b1)@W2+b2)@W3+b3)
# ---------------------------------------------------------------------------
def _actor_kernel(x_ref, w1_ref, b1_ref, w2_ref, b2_ref, w3_ref, b3_ref, out_ref):
    """x_ref: (TB, In_p) bf16; w*: bf16; b*: (1, dim) f32; out_ref: (TB, Out_p)."""
    x = x_ref[...]

    # layer 1: bf16 MXU pass, f32 accumulate; downcast BEFORE the ReLU so the
    # max runs on bf16 vregs (2x elements per VPU op on v6e/v7x).
    h = jnp.dot(x, w1_ref[...], preferred_element_type=jnp.float32) + b1_ref[...]
    h = jnp.maximum(h.astype(jnp.bfloat16), 0)

    # layer 2
    h = jnp.dot(h, w2_ref[...], preferred_element_type=jnp.float32) + b2_ref[...]
    h = jnp.maximum(h.astype(jnp.bfloat16), 0)

    # layer 3 + tanh (EUP slot); store in the output dtype (bf16 by default
    # -> less HBM writeback; tanh output in [-1, 1] tolerates bf16).
    a = jnp.dot(h, w3_ref[...], preferred_element_type=jnp.float32) + b3_ref[...]
    out_ref[...] = jnp.tanh(a).astype(out_ref.dtype)


# ---------------------------------------------------------------------------
# Jitted forward on pre-padded parameters
# ---------------------------------------------------------------------------
@functools.partial(jax.jit, static_argnames=("out_size", "out_dtype", "single_buffer"))
def _actor_forward_impl(state, w1_p, b1_p, w2_p, b2_p, w3_p, b3_p,
                        *, out_size, out_dtype, single_buffer):
    B, In = state.shape
    In_p, H_p = w1_p.shape
    Out_p = w3_p.shape[1]

    # ---- balanced batch tiling -------------------------------------------
    B_p8 = _round_up(B, 8)
    nb = _cdiv(B_p8, 512)
    if B_p8 >= 16:
        nb = max(nb, 2)                 # >=2 tiles: v7x's 2nd TensorCore works too
    TB = _round_up(_cdiv(B_p8, nb), 8)  # balanced tiles, <=7 pure-padding rows each
    B_p = nb * TB

    # Only the activations are padded per call (weights were padded once).
    x_p = jnp.zeros((B_p, In_p), jnp.bfloat16)
    x_p = x_p.at[:B, :In].set(state.astype(jnp.bfloat16))

    def resident(shape):
        # Constant index_map -> DMA'd once, stays in VMEM across batch tiles.
        # Single-buffer it: there is nothing to double-buffer.
        if single_buffer and hasattr(pl, "Buffered"):
            return pl.BlockSpec(shape, lambda i: (0, 0),
                                pipeline_mode=pl.Buffered(1))
        return pl.BlockSpec(shape, lambda i: (0, 0))

    flops = 2 * B_p * (In_p * H_p + H_p * H_p + H_p * Out_p)
    bytes_accessed = (
        B_p * In_p * 2                                      # activations in (bf16)
        + (In_p * H_p + H_p * H_p + H_p * Out_p) * 2        # weights (bf16)
        + (2 * H_p + Out_p) * 4                             # biases (f32)
        + B_p * Out_p * jnp.dtype(out_dtype).itemsize)      # output

    out_p = pl.pallas_call(
        _actor_kernel,
        out_shape=jax.ShapeDtypeStruct((B_p, Out_p), out_dtype),
        grid=(nb,),
        in_specs=[
            pl.BlockSpec((TB, In_p), lambda i: (i, 0)),     # activations: tiled
            resident((In_p, H_p)), resident((1, H_p)),      # layer 1 (resident)
            resident((H_p, H_p)), resident((1, H_p)),       # layer 2
            resident((H_p, Out_p)), resident((1, Out_p)),   # layer 3
        ],
        out_specs=pl.BlockSpec((TB, Out_p), lambda i: (i, 0)),  # lane-dense store
        compiler_params=pltpu.CompilerParams(
            dimension_semantics=("parallel",),  # batch tiles shard across TCs (v7x)
        ),
        cost_estimate=pl.CostEstimate(
            flops=flops,
            transcendentals=B_p * Out_p,
            bytes_accessed=bytes_accessed),
    )(x_p, w1_p, b1_p, w2_p, b2_p, w3_p, b3_p)

    # Strip padding.
    return out_p[:B, :out_size]


def actor_forward(state, params, out_dtype=jnp.bfloat16):
    """Pallas-backed Actor.forward(state).

    state:  (B, input_size) f32
    params: dict from prepare_actor_params (pre-padded bf16 weights, f32 biases)
    returns (B, output_size) actions in [-1, 1] (bf16 by default).
    """
    args = (state, params["w1"], params["b1"], params["w2"], params["b2"],
            params["w3"], params["b3"])
    kwargs = dict(out_size=params["out_size"], out_dtype=out_dtype)
    try:
        return _actor_forward_impl(*args, single_buffer=True, **kwargs)
    except Exception:
        # Fallback for jax versions without BlockSpec pipeline_mode / Buffered.
        return _actor_forward_impl(*args, single_buffer=False, **kwargs)


# ---------------------------------------------------------------------------
# Parameter construction / one-time padding
# ---------------------------------------------------------------------------
def xavier_uniform(key, fan_in, fan_out, dtype=jnp.float32):
    limit = jnp.sqrt(6.0 / (fan_in + fan_out)).astype(dtype)
    # Stored as (in, out) so the kernel computes x @ W directly
    # (transpose of PyTorch nn.Linear's (out, in) weight layout).
    return jax.random.uniform(key, (fan_in, fan_out), dtype=dtype,
                              minval=-limit, maxval=limit)


def make_actor_params(key, input_size, hidden_size, output_size):
    """Unpadded f32 parameters matching the PyTorch Actor (xavier weights,
    default-style uniform biases)."""
    k1, k2, k3, k4, k5, k6 = jax.random.split(key, 6)

    def bias(k, fan_in, n):
        bound = 1.0 / jnp.sqrt(float(fan_in))
        return jax.random.uniform(k, (1, n), jnp.float32, -bound, bound)

    w1 = xavier_uniform(k1, input_size, hidden_size)
    w2 = xavier_uniform(k2, hidden_size, hidden_size)
    w3 = xavier_uniform(k3, hidden_size, output_size)
    b1 = bias(k4, input_size, hidden_size)
    b2 = bias(k5, hidden_size, hidden_size)
    b3 = bias(k6, hidden_size, output_size)
    return w1, b1, w2, b2, w3, b3


def prepare_actor_params(w1, b1, w2, b2, w3, b3):
    """One-time pad-to-128 + bf16 cast (hoisted out of actor_forward)."""
    In, H = w1.shape
    Out = w3.shape[1]
    In_p, H_p, Out_p = (_round_up(d, 128) for d in (In, H, Out))

    def pad_w(w, r, c):
        return jnp.zeros((r, c), jnp.bfloat16).at[:w.shape[0], :w.shape[1]].set(
            w.astype(jnp.bfloat16))

    def pad_b(b, c):
        b = jnp.asarray(b, jnp.float32).reshape(1, -1)
        return jnp.zeros((1, c), jnp.float32).at[:, :b.shape[1]].set(b)

    return {
        "w1": pad_w(w1, In_p, H_p), "b1": pad_b(b1, H_p),
        "w2": pad_w(w2, H_p, H_p), "b2": pad_b(b2, H_p),
        "w3": pad_w(w3, H_p, Out_p), "b3": pad_b(b3, Out_p),
        "in_size": In, "out_size": Out,
    }


def reference_forward(state, w1, b1, w2, b2, w3, b3):
    """Pure-JAX reference using the same bf16-weight / f32-accumulate recipe."""
    xb = state.astype(jnp.bfloat16)
    h1 = jax.nn.relu(
        jnp.dot(xb, w1.astype(jnp.bfloat16),
                preferred_element_type=jnp.float32) + b1).astype(jnp.bfloat16)
    h2 = jax.nn.relu(
        jnp.dot(h1, w2.astype(jnp.bfloat16),
                preferred_element_type=jnp.float32) + b2).astype(jnp.bfloat16)
    a = jnp.dot(h2, w3.astype(jnp.bfloat16),
                preferred_element_type=jnp.float32) + b3
    return jnp.tanh(a)


if __name__ == "__main__":
    # Small shapes consistent with the module's forward (MLP on a state vector).
    input_size, hidden_size, output_size = 16, 32, 8

    key = jax.random.PRNGKey(0)
    k_state1, k_state2, k_params = jax.random.split(key, 3)

    raw_params = make_actor_params(k_params, input_size, hidden_size, output_size)
    params = prepare_actor_params(*raw_params)   # one-time pad + bf16 cast

    # TODO(synk): OUNoise / select_action(noiseFlag=True) is a stateful host-side
    # sampler, not part of the forward compute graph; only forward() is a kernel.

    # Exercise both the single-tile path (B=2) and the multi-tile path (B=20
    # -> 2 batch tiles with balanced padding).
    for k_s, batch in ((k_state1, 2), (k_state2, 20)):
        state = jax.random.normal(k_s, (batch, input_size), dtype=jnp.float32)
        action = actor_forward(state, params)
        jax.block_until_ready(action)

        ref = reference_forward(state, *raw_params)
        assert action.shape == (batch, output_size)
        assert jnp.allclose(action.astype(jnp.float32), ref,
                            atol=1e-2, rtol=1e-2), f"mismatch at batch={batch}"

    print("KERNEL_OK")
</pallas_src>

<mosaic_0001>
module attributes {stable_mosaic.version = 11 : i64} {
  func.func @_actor_kernel(%arg0: i32, %arg1: memref<8x128xbf16, #tpu.memory_space<vmem>>, %arg2: memref<128x128xbf16, #tpu.memory_space<vmem>>, %arg3: memref<1x128xf32, #tpu.memory_space<vmem>>, %arg4: memref<128x128xbf16, #tpu.memory_space<vmem>>, %arg5: memref<1x128xf32, #tpu.memory_space<vmem>>, %arg6: memref<128x128xbf16, #tpu.memory_space<vmem>>, %arg7: memref<1x128xf32, #tpu.memory_space<vmem>>, %arg8: memref<8x128xbf16, #tpu.memory_space<vmem>>) attributes {dimension_semantics = [#tpu.dimension_semantics<parallel>], iteration_bounds = array<i64: 1>, scalar_prefetch = 0 : i64, scratch_operands = 0 : i64, tpu.core_type = #tpu.core_type<tc>, window_params = [{transform_indices = @transform_0, window_bounds = array<i64: 8, 128>}, {pipeline_mode = #tpu.pipeline_mode<synchronous>, transform_indices = @transform_1, window_bounds = array<i64: 128, 128>}, {pipeline_mode = #tpu.pipeline_mode<synchronous>, transform_indices = @transform_2, window_bounds = array<i64: 1, 128>}, {pipeline_mode = #tpu.pipeline_mode<synchronous>, transform_indices = @transform_3, window_bounds = array<i64: 128, 128>}, {pipeline_mode = #tpu.pipeline_mode<synchronous>, transform_indices = @transform_4, window_bounds = array<i64: 1, 128>}, {pipeline_mode = #tpu.pipeline_mode<synchronous>, transform_indices = @transform_5, window_bounds = array<i64: 128, 128>}, {pipeline_mode = #tpu.pipeline_mode<synchronous>, transform_indices = @transform_6, window_bounds = array<i64: 1, 128>}, {transform_indices = @transform_7, window_bounds = array<i64: 8, 128>}]} {
    %c0 = arith.constant 0 : index
    %c0_0 = arith.constant 0 : index
    %0 = vector.load %arg1[%c0, %c0_0] : memref<8x128xbf16, #tpu.memory_space<vmem>>, vector<8x128xbf16>
    %c0_1 = arith.constant 0 : index
    %c0_2 = arith.constant 0 : index
    %1 = vector.load %arg2[%c0_1, %c0_2] : memref<128x128xbf16, #tpu.memory_space<vmem>>, vector<128x128xbf16>
    %cst = arith.constant dense<0.000000e+00> : vector<8x128xf32>
    %2 = tpu.matmul %0, %1, %cst {dimension_numbers = #tpu.dot_dimension_numbers<[1], [0], [0], [1], [0, 0, 1, 1], [], []>} : vector<8x128xbf16>, vector<128x128xbf16>, vector<8x128xf32> -> vector<8x128xf32>
    %c0_3 = arith.constant 0 : index
    %c0_4 = arith.constant 0 : index
    %3 = vector.load %arg3[%c0_3, %c0_4] : memref<1x128xf32, #tpu.memory_space<vmem>>, vector<1x128xf32>
    %4 = vector.broadcast %3 : vector<1x128xf32> to vector<8x128xf32>
    %5 = arith.addf %2, %4 : vector<8x128xf32>
    %6 = arith.truncf %5 : vector<8x128xf32> to vector<8x128xbf16>
    %cst_5 = arith.constant 0.000000e+00 : bf16
    %7 = vector.broadcast %cst_5 : bf16 to vector<8x128xbf16>
    %8 = arith.maximumf %6, %7 : vector<8x128xbf16>
    %c0_6 = arith.constant 0 : index
    %c0_7 = arith.constant 0 : index
    %9 = vector.load %arg4[%c0_6, %c0_7] : memref<128x128xbf16, #tpu.memory_space<vmem>>, vector<128x128xbf16>
    %cst_8 = arith.constant dense<0.000000e+00> : vector<8x128xf32>
    %10 = tpu.matmul %8, %9, %cst_8 {dimension_numbers = #tpu.dot_dimension_numbers<[1], [0], [0], [1], [0, 0, 1, 1], [], []>} : vector<8x128xbf16>, vector<128x128xbf16>, vector<8x128xf32> -> vector<8x128xf32>
    %c0_9 = arith.constant 0 : index
    %c0_10 = arith.constant 0 : index
    %11 = vector.load %arg5[%c0_9, %c0_10] : memref<1x128xf32, #tpu.memory_space<vmem>>, vector<1x128xf32>
    %12 = vector.broadcast %11 : vector<1x128xf32> to vector<8x128xf32>
    %13 = arith.addf %10, %12 : vector<8x128xf32>
    %14 = arith.truncf %13 : vector<8x128xf32> to vector<8x128xbf16>
    %cst_11 = arith.constant 0.000000e+00 : bf16
    %15 = vector.broadcast %cst_11 : bf16 to vector<8x128xbf16>
    %16 = arith.maximumf %14, %15 : vector<8x128xbf16>
    %c0_12 = arith.constant 0 : index
    %c0_13 = arith.constant 0 : index
    %17 = vector.load %arg6[%c0_12, %c0_13] : memref<128x128xbf16, #tpu.memory_space<vmem>>, vector<128x128xbf16>
    %cst_14 = arith.constant dense<0.000000e+00> : vector<8x128xf32>
    %18 = tpu.matmul %16, %17, %cst_14 {dimension_numbers = #tpu.dot_dimension_numbers<[1], [0], [0], [1], [0, 0, 1, 1], [], []>} : vector<8x128xbf16>, vector<128x128xbf16>, vector<8x128xf32> -> vector<8x128xf32>
    %c0_15 = arith.constant 0 : index
    %c0_16 = arith.constant 0 : index
    %19 = vector.load %arg7[%c0_15, %c0_16] : memref<1x128xf32, #tpu.memory_space<vmem>>, vector<1x128xf32>
    %20 = vector.broadcast %19 : vector<1x128xf32> to vector<8x128xf32>
    %21 = arith.addf %18, %20 : vector<8x128xf32>
    %22 = math.tanh %21 : vector<8x128xf32>
    %23 = arith.truncf %22 : vector<8x128xf32> to vector<8x128xbf16>
    %c0_17 = arith.constant 0 : index
    %c0_18 = arith.constant 0 : index
    %24 = vector.load %arg8[%c0_17, %c0_18] : memref<8x128xbf16, #tpu.memory_space<vmem>>, vector<8x128xbf16>
    tpu.vector_store %arg8[%c0_17, %c0_18], %23 {strides = array<i32>} : memref<8x128xbf16, #tpu.memory_space<vmem>>, vector<8x128xbf16>,
    return
  }
  func.func @transform_0(%arg0: i32) -> (i32, i32) {
    %c0_i32 = arith.constant 0 : i32
    %c0_i32_0 = arith.constant 0 : i32
    return %arg0, %c0_i32 : i32, i32
  }
  func.func @transform_1(%arg0: i32) -> (i32, i32) {
    %c0_i32 = arith.constant 0 : i32
    %c0_i32_0 = arith.constant 0 : i32
    %c0_i32_1 = arith.constant 0 : i32
    return %c0_i32, %c0_i32_0 : i32, i32
  }
  func.func @transform_2(%arg0: i32) -> (i32, i32) {
    %c0_i32 = arith.constant 0 : i32
    %c0_i32_0 = arith.constant 0 : i32
    %c0_i32_1 = arith.constant 0 : i32
    return %c0_i32, %c0_i32_0 : i32, i32
  }
  func.func @transform_3(%arg0: i32) -> (i32, i32) {
    %c0_i32 = arith.constant 0 : i32
    %c0_i32_0 = arith.constant 0 : i32
    %c0_i32_1 = arith.constant 0 : i32
    return %c0_i32, %c0_i32_0 : i32, i32
  }
  func.func @transform_4(%arg0: i32) -> (i32, i32) {
    %c0_i32 = arith.constant 0 : i32
    %c0_i32_0 = arith.constant 0 : i32
    %c0_i32_1 = arith.constant 0 : i32
    return %c0_i32, %c0_i32_0 : i32, i32
  }
  func.func @transform_5(%arg0: i32) -> (i32, i32) {
    %c0_i32 = arith.constant 0 : i32
    %c0_i32_0 = arith.constant 0 : i32
    %c0_i32_1 = arith.constant 0 : i32
    return %c0_i32, %c0_i32_0 : i32, i32
  }
  func.func @transform_6(%arg0: i32) -> (i32, i32) {
    %c0_i32 = arith.constant 0 : i32
    %c0_i32_0 = arith.constant 0 : i32
    %c0_i32_1 = arith.constant 0 : i32
    return %c0_i32, %c0_i32_0 : i32, i32
  }
  func.func @transform_7(%arg0: i32) -> (i32, i32) {
    %c0_i32 = arith.constant 0 : i32
    %c0_i32_0 = arith.constant 0 : i32
    return %arg0, %c0_i32 : i32, i32
  }
}

module attributes {stable_mosaic.version = 11 : i64} {
  func.func @_actor_kernel(%arg0: i32, %arg1: memref<8x128xbf16, #tpu.memory_space<vmem>>, %arg2: memref<128x128xbf16, #tpu.memory_space<vmem>>, %arg3: memref<1x128xf32, #tpu.memory_space<vmem>>, %arg4: memref<128x128xbf16, #tpu.memory_space<vmem>>, %arg5: memref<1x128xf32, #tpu.memory_space<vmem>>, %arg6: memref<128x128xbf16, #tpu.memory_space<vmem>>, %arg7: memref<1x128xf32, #tpu.memory_space<vmem>>, %arg8: memref<8x128xbf16, #tpu.memory_space<vmem>>) attributes {dimension_semantics = [#tpu.dimension_semantics<parallel>], iteration_bounds = array<i64: 1>, scalar_prefetch = 0 : i64, scratch_operands = 0 : i64, tpu.core_type = #tpu.core_type<tc>, window_params = [{transform_indices = @transform_0, window_bounds = array<i64: 8, 128>}, {pipeline_mode = #tpu.pipeline_mode<synchronous>, transform_indices = @transform_1, window_bounds = array<i64: 128, 128>}, {pipeline_mode = #tpu.pipeline_mode<synchronous>, transform_indices = @transform_2, window_bounds = array<i64: 1, 128>}, {pipeline_mode = #tpu.pipeline_mode<synchronous>, transform_indices = @transform_3, window_bounds = array<i64: 128, 128>}, {pipeline_mode = #tpu.pipeline_mode<synchronous>, transform_indices = @transform_4, window_bounds = array<i64: 1, 128>}, {pipeline_mode = #tpu.pipeline_mode<synchronous>, transform_indices = @transform_5, window_bounds = array<i64: 128, 128>}, {pipeline_mode = #tpu.pipeline_mode<synchronous>, transform_indices = @transform_6, window_bounds = array<i64: 1, 128>}, {transform_indices = @transform_7, window_bounds = array<i64: 8, 128>}]} {
    %c0 = arith.constant 0 : index
    %c0_0 = arith.constant 0 : index
    %0 = vector.load %arg1[%c0, %c0_0] : memref<8x128xbf16, #tpu.memory_space<vmem>>, vector<8x128xbf16>
    %c0_1 = arith.constant 0 : index
    %c0_2 = arith.constant 0 : index
    %1 = vector.load %arg2[%c0_1, %c0_2] : memref<128x128xbf16, #tpu.memory_space<vmem>>, vector<128x128xbf16>
    %cst = arith.constant dense<0.000000e+00> : vector<8x128xf32>
    %2 = tpu.matmul %0, %1, %cst {dimension_numbers = #tpu.dot_dimension_numbers<[1], [0], [0], [1], [0, 0, 1, 1], [], []>} : vector<8x128xbf16>, vector<128x128xbf16>, vector<8x128xf32> -> vector<8x128xf32>
    %c0_3 = arith.constant 0 : index
    %c0_4 = arith.constant 0 : index
    %3 = vector.load %arg3[%c0_3, %c0_4] : memref<1x128xf32, #tpu.memory_space<vmem>>, vector<1x128xf32>
    %4 = vector.broadcast %3 : vector<1x128xf32> to vector<8x128xf32>
    %5 = arith.addf %2, %4 : vector<8x128xf32>
    %6 = arith.truncf %5 : vector<8x128xf32> to vector<8x128xbf16>
    %cst_5 = arith.constant 0.000000e+00 : bf16
    %7 = vector.broadcast %cst_5 : bf16 to vector<8x128xbf16>
    %8 = arith.maximumf %6, %7 : vector<8x128xbf16>
    %c0_6 = arith.constant 0 : index
    %c0_7 = arith.constant 0 : index
    %9 = vector.load %arg4[%c0_6, %c0_7] : memref<128x128xbf16, #tpu.memory_space<vmem>>, vector<128x128xbf16>
    %cst_8 = arith.constant dense<0.000000e+00> : vector<8x128xf32>
    %10 = tpu.matmul %8, %9, %cst_8 {dimension_numbers = #tpu.dot_dimension_numbers<[1], [0], [0], [1], [0, 0, 1, 1], [], []>} : vector<8x128xbf16>, vector<128x128xbf16>, vector<8x128xf32> -> vector<8x128xf32>
    %c0_9 = arith.constant 0 : index
    %c0_10 = arith.constant 0 : index
    %11 = vector.load %arg5[%c0_9, %c0_10] : memref<1x128xf32, #tpu.memory_space<vmem>>, vector<1x128xf32>
    %12 = vector.broadcast %11 : vector<1x128xf32> to vector<8x128xf32>
    %13 = arith.addf %10, %12 : vector<8x128xf32>
    %14 = arith.truncf %13 : vector<8x128xf32> to vector<8x128xbf16>
    %cst_11 = arith.constant 0.000000e+00 : bf16
    %15 = vector.broadcast %cst_11 : bf16 to vector<8x128xbf16>
    %16 = arith.maximumf %14, %15 : vector<8x128xbf16>
    %c0_12 = arith.constant 0 : index
    %c0_13 = arith.constant 0 : index
    %17 = vector.load %arg6[%c0_12, %c0_13] : memref<128x128xbf16, #tpu.memory_space<vmem>>, vector<128x128xbf16>
    %cst_14 = arith.constant dense<0.000000e+00> : vector<8x128xf32>
    %18 = tpu.matmul %16, %17, %cst_14 {dimension_numbers = #tpu.dot_dimension_numbers<[1], [0], [0], [1], [0, 0, 1, 1], [], []>} : vector<8x128xbf16>, vector<128x128xbf16>, vector<8x128xf32> -> vector<8x128xf32>
    %c0_15 = arith.constant 0 : index
    %c0_16 = arith.constant 0 : index
    %19 = vector.load %arg7[%c0_15, %c0_16] : memref<1x128xf32, #tpu.memory_space<vmem>>, vector<1x128xf32>
    %20 = vector.broadcast %19 : vector<1x128xf32> to vector<8x128xf32>
    %21 = arith.addf %18, %20 : vector<8x128xf32>
    %22 = math.tanh %21 : vector<8x128xf32>
    %23 = arith.truncf %22 : vector<8x128xf32> to vector<8x128xbf16>
    %c0_17 = arith.constant 0 : index
    %c0_18 = arith.constant 0 : index
    %24 = vector.load %arg8[%c0_17, %c0_18] : memref<8x128xbf16, #tpu.memory_space<vmem>>, vector<8x128xbf16>
    tpu.vector_store %arg8[%c0_17, %c0_18], %23 {strides = array<i32>} : memref<8x128xbf16, #tpu.memory_space<vmem>>, vector<8x128xbf16>,
    return
  }
  func.func @transform_0(%arg0: i32) -> (i32, i32) {
    %c0_i32 = arith.constant 0 : i32
    %c0_i32_0 = arith.constant 0 : i32
    return %arg0, %c0_i32 : i32, i32
  }
  func.func @transform_1(%arg0: i32) -> (i32, i32) {
    %c0_i32 = arith.constant 0 : i32
    %c0_i32_0 = arith.constant 0 : i32
    %c0_i32_1 = arith.constant 0 : i32
    return %c0_i32, %c0_i32_0 : i32, i32
  }
  func.func @transform_2(%arg0: i32) -> (i32, i32) {
    %c0_i32 = arith.constant 0 : i32
    %c0_i32_0 = arith.constant 0 : i32
    %c0_i32_1 = arith.constant 0 : i32
    return %c0_i32, %c0_i32_0 : i32, i32
  }
  func.func @transform_3(%arg0: i32) -> (i32, i32) {
    %c0_i32 = arith.constant 0 : i32
    %c0_i32_0 = arith.constant 0 : i32
    %c0_i32_1 = arith.constant 0 : i32
    return %c0_i32, %c0_i32_0 : i32, i32
  }
  func.func @transform_4(%arg0: i32) -> (i32, i32) {
    %c0_i32 = arith.constant 0 : i32
    %c0_i32_0 = arith.constant 0 : i32
    %c0_i32_1 = arith.constant 0 : i32
    return %c0_i32, %c0_i32_0 : i32, i32
  }
  func.func @transform_5(%arg0: i32) -> (i32, i32) {
    %c0_i32 = arith.constant 0 : i32
    %c0_i32_0 = arith.constant 0 : i32
    %c0_i32_1 = arith.constant 0 : i32
    return %c0_i32, %c0_i32_0 : i32, i32
  }
  func.func @transform_6(%arg0: i32) -> (i32, i32) {
    %c0_i32 = arith.constant 0 : i32
    %c0_i32_0 = arith.constant 0 : i32
    %c0_i32_1 = arith.constant 0 : i32
    return %c0_i32, %c0_i32_0 : i32, i32
  }
  func.func @transform_7(%arg0: i32) -> (i32, i32) {
    %c0_i32 = arith.constant 0 : i32
    %c0_i32_0 = arith.constant 0 : i32
    return %arg0, %c0_i32 : i32, i32
  }
}

</mosaic_0001>

<bundles_post_ra>
// kernel: _actor_forward_impl.1
= control target key start
LH: loop header
LB: loop body
LE: loop exit
PB: predicated region body
PF: predicated region fallthrough
CT: control target
= control target key end

     0   :  { %12 = vsyncpa [#allocation3], 0  ;;  %s609_s0 = inlined_call_operand.vmem [shape: bf16[8,128], index: 0, kind: input, shape index: {}]   ;;  %s610_s1 = inlined_call_operand.hbm [shape: bf16[128,128], index: 1, kind: input, shape index: {}]   ;;  %s611_s2 = inlined_call_operand.vmem [shape: f32[1,128], index: 2, kind: input, shape index: {}]   ;;  %s612_s3 = inlined_call_operand.hbm [shape: bf16[128,128], index: 3, kind: input, shape index: {}]   ;;  %s613_s4 = inlined_call_operand.vmem [shape: f32[1,128], index: 4, kind: input, shape index: {}]   ;;  %s614_s5 = inlined_call_operand.hbm [shape: bf16[128,128], index: 5, kind: input, shape index: {}]   ;;  %s615_s6 = inlined_call_operand.vmem [shape: f32[1,128], index: 6, kind: input, shape index: {}]   ;;  %s616_s7 = inlined_call_operand.vmem [shape: bf16[8,128], index: 7, kind: output, shape index: {}]  }
   0x1   :  { %13 = vsyncpa [#allocation5], 0  ;;  %s35_s26 = sshll.u32 %s612_s3, 4  ;;  %s540_s27 = smov [#allocation4]   ;;  %s36_s26 = int_to_ptr.hbm [resolvable:$true] %s35_s26 }
   0x2   :  { %s37_s28 = sshll.u32 %s540_s27, 4  ;;  %s20_s8 = sshll.u32 %s610_s1, 4  ;;  %s38_s28 = int_to_ptr.vmem [resolvable:$true] %s37_s28  ;;  %s21_s8 = int_to_ptr.hbm [resolvable:$true] %s20_s8 }
   0x3   :  { %s541_s9 = smov 64   ;;  %s542_s10 = smov 4  }
   0x4   :  { %43 = dma.hbm_to_vmem [thread:$0]  %s36_s26, 1024, %s38_s28, [#allocation5], %s541_s9, %s541_s9, %s542_s10  }
   0x5   :  { %s543_s11 = smov [#allocation2]   ;;  %s50_s15 = sshll.u32 %s614_s5, 4  ;;  %s51_s15 = int_to_ptr.hbm [resolvable:$true] %s50_s15 }
   0x6   :  { %s22_s12 = sshll.u32 %s543_s11, 4  ;;  %s544_s3 = smov [#allocation6]   ;;  %s23_s12 = int_to_ptr.vmem [resolvable:$true] %s22_s12 }
   0x7   :  { %28 = dma.hbm_to_vmem [thread:$0]  %s21_s8, 1024, %s23_s12, [#allocation3], %s541_s9, %s541_s9, %s542_s10  }
   0x8   :  { %s52_s16 = sshll.u32 %s544_s3, 4  ;;  %s53_s16 = int_to_ptr.vmem [resolvable:$true] %s52_s16 }
   0x9   :  { %58 = dma.hbm_to_vmem [thread:$0]  %s51_s15, 1024, %s53_s16, [#allocation5], %s541_s9, %s541_s9, %s542_s10  }
   0xa   :  { %536 = dma.done.wait [#allocation3], 1024  }
   0xb   :  { %537 = vsyncadd [#allocation3], 4294966272 }
   0xc   :  { %538 = dma.done.wait [#allocation5], 2048  }
   0xd   :  { %539 = vsyncadd [#allocation5], 4294965248  ;;  %v437_v0 = vld [vmem:[#allocation2 + $0x38] sm:$0xff]  ;;  %v436_v1 = vld [vmem:[#allocation2 + $0x30] sm:$0xff] }
   0xe   :  { %142 = vmatpush.bf16.msra.mxu0 %v437_v0  ;;  %v445_v2 = vld [vmem:[#allocation4 + $0x38] sm:$0xff]  ;;  %v444_v3 = vld [vmem:[#allocation4 + $0x30] sm:$0xff]  ;;  %v435_v4 = vld [vmem:[#allocation2 + $0x28] sm:$0xff] }
   0xf   :  { %227 = vmatpush.bf16.msra.mxu1 %v445_v2  ;;  %v443_v5 = vld [vmem:[#allocation4 + $0x28] sm:$0xff]  ;;  %v434_v6 = vld [vmem:[#allocation2 + $0x20] sm:$0xff]  ;;  %v433_v8 = vld [vmem:[#allocation2 + $0x18] sm:$0xff] }
  0x10   :  { %v442_v7 = vld [vmem:[#allocation4 + $0x20] sm:$0xff]  ;;  %v441_v9 = vld [vmem:[#allocation4 + $0x18] sm:$0xff]  ;;  %v432_v10 = vld [vmem:[#allocation2 + $0x10] sm:$0xff] }
  0x11   :  { %v440_v11 = vld [vmem:[#allocation4 + $0x10] sm:$0xff]  ;;  %v431_v12 = vld [vmem:[#allocation2 + $0x8] sm:$0xff]  ;;  %v430_v13 = vld [vmem:[#allocation2] sm:$0xff] }
  0x12   :  { %143 = vmatpush.bf16.msra.mxu0 %v436_v1  ;;  %v73_v14 = vld [vmem:[%s609_s0] sm:$0xf]  ;;  %v439_v15 = vld [vmem:[#allocation4 + $0x8] sm:$0xff]  ;;  %v453_v17 = vld [vmem:[#allocation6 + $0x38] sm:$0xff] }
  0x13   :  { %228 = vmatpush.bf16.msra.mxu1 %v444_v3  ;;  %v438_v16 = vld [vmem:[#allocation4] sm:$0xff]  ;;  %312 = vmatpush.bf16.msra.mxu2 %v453_v17  ;;  %v452_v18 = vld [vmem:[#allocation6 + $0x30] sm:$0xff]  ;;  %v451_v19 = vld [vmem:[#allocation6 + $0x28] sm:$0xff] }
  0x14   :  { %v450_v20 = vld [vmem:[#allocation6 + $0x20] sm:$0xff]  ;;  %v449_v21 = vld [vmem:[#allocation6 + $0x18] sm:$0xff]  ;;  %v448_v22 = vld [vmem:[#allocation6 + $0x10] sm:$0xff] }
  0x15   :  { %v459_v23 = vld [vmem:[%s611_s2] ss:$0 sm:$0xff]  ;;  %v447_v29 = vld [vmem:[#allocation6 + $0x8] sm:$0xff] }
  0x16   :  { %144 = vmatpush.bf16.msra.mxu0 %v435_v4  ;;  %v446_v30 = vld [vmem:[#allocation6] sm:$0xff] }
  0x17   :  { %229 = vmatpush.bf16.msra.mxu1 %v443_v5  ;;  %313 = vmatpush.bf16.msra.mxu2 %v452_v18  ;;  %v460_v31 = vld [vmem:[%s613_s4] ss:$0 sm:$0xff] }
  0x18   :  { %v461_v37 = vld [vmem:[%s615_s6] ss:$0 sm:$0xff] }
  0x1a   :  { %145 = vmatpush.bf16.msra.mxu0 %v434_v6 }
  0x1b   :  { %230 = vmatpush.bf16.msra.mxu1 %v442_v7  ;;  %314 = vmatpush.bf16.msra.mxu2 %v451_v19 }
  0x1e   :  { %146 = vmatpush.bf16.msra.mxu0 %v433_v8 }
  0x1f   :  { %231 = vmatpush.bf16.msra.mxu1 %v441_v9  ;;  %315 = vmatpush.bf16.msra.mxu2 %v450_v20 }
  0x22   :  { %147 = vmatpush.bf16.msra.mxu0 %v432_v10 }
  0x23   :  { %232 = vmatpush.bf16.msra.mxu1 %v440_v11  ;;  %316 = vmatpush.bf16.msra.mxu2 %v449_v21 }
  0x26   :  { %148 = vmatpush.bf16.msra.mxu0 %v431_v12 }
  0x27   :  { %233 = vmatpush.bf16.msra.mxu1 %v439_v15  ;;  %317 = vmatpush.bf16.msra.mxu2 %v448_v22 }
  0x2a   :  { %149 = vmatpush.bf16.msra.mxu0 %v430_v13 }
  0x2b   :  { %234 = vmatpush.bf16.msra.mxu1 %v438_v16  ;;  %318 = vmatpush.bf16.msra.mxu2 %v447_v29 }
  0x2d   :  { %150 = vmatmul.bf16.vlgmr.msra.gmra.mxu0 %v73_v14 }
  0x2f   :  { %319 = vmatpush.bf16.msra.mxu2 %v446_v30 }
  0xaa   :  { %v151_v24 = vpop.f32.mrf.mxu0 }
  0xab   :  { %v152_v25 = vadd.f32 %v459_v23, %v151_v24 }
  0xad   :  { %v157_v26 = vmax.f32 %v152_v25, 0.0 }
  0xaf   :  { %v158_v27 = vpack.c.bf16 %v157_v26, %v157_v26 }
  0xb1   :  { %235 = vmatmul.bf16.vlgmr.msra.gmra.mxu1 %v158_v27 }
  0xb2   :  { %v153_v28 = vpop.f32.mrf.mxu0 }
 0x12e   :  { %v236_v32 = vpop.f32.mrf.mxu1 }
 0x12f   :  { %v237_v33 = vadd.f32 %v460_v31, %v236_v32 }
 0x131   :  { %v242_v34 = vmax.f32 %v237_v33, 0.0 }
 0x133   :  { %v243_v35 = vpack.c.bf16 %v242_v34, %v242_v34 }
 0x135   :  { %320 = vmatmul.bf16.vlgmr.msra.gmra.mxu2 %v243_v35 }
 0x136   :  { %v238_v36 = vpop.f32.mrf.mxu1 }
 0x1b8   :  { %v321_v38 = vpop.f32.mrf.mxu2 }
 0x1b9   :  { %v322_v39 = vadd.f32 %v461_v37, %v321_v38 }
 0x1bb   :  { %462 = vtanh.f32 %v322_v39 }
 0x1c0   :  { %v323_v40 = vpop.f32.mrf.mxu2 }
 0x1c1   :  { %v463_v41 = vpop.eup %462 }
 0x1c2   :  { %v326_v42 = vpack.c.bf16 %v463_v41, %v463_v41 }
 0x1c4   :  { %327 = vst [vmem:[%s616_s7] sm:$0xf] %v326_v42 }
 0x1c5   :  { %332 = vsyncpa [#allocation3], 1 }
 0x1c6   :  { %333 = vsyncpa [#allocation5], 1 }

// kernel: _actor_forward_impl.1
= control target key start
LH: loop header
LB: loop body
LE: loop exit
PB: predicated region body
PF: predicated region fallthrough
CT: control target
= control target key end

     0   :  { %12 = vsyncpa [#allocation3], 0  ;;  %s609_s0 = inlined_call_operand.vmem [shape: bf16[8,128], index: 0, kind: input, shape index: {}]   ;;  %s610_s1 = inlined_call_operand.hbm [shape: bf16[128,128], index: 1, kind: input, shape index: {}]   ;;  %s611_s2 = inlined_call_operand.vmem [shape: f32[1,128], index: 2, kind: input, shape index: {}]   ;;  %s612_s3 = inlined_call_operand.hbm [shape: bf16[128,128], index: 3, kind: input, shape index: {}]   ;;  %s613_s4 = inlined_call_operand.vmem [shape: f32[1,128], index: 4, kind: input, shape index: {}]   ;;  %s614_s5 = inlined_call_operand.hbm [shape: bf16[128,128], index: 5, kind: input, shape index: {}]   ;;  %s615_s6 = inlined_call_operand.vmem [shape: f32[1,128], index: 6, kind: input, shape index: {}]   ;;  %s616_s7 = inlined_call_operand.vmem [shape: bf16[8,128], index: 7, kind: output, shape index: {}]  }
   0x1   :  { %13 = vsyncpa [#allocation5], 0  ;;  %s35_s26 = sshll.u32 %s612_s3, 4  ;;  %s540_s27 = smov [#allocation4]   ;;  %s36_s26 = int_to_ptr.hbm [resolvable:$true] %s35_s26 }
   0x2   :  { %s37_s28 = sshll.u32 %s540_s27, 4  ;;  %s20_s8 = sshll.u32 %s610_s1, 4  ;;  %s38_s28 = int_to_ptr.vmem [resolvable:$true] %s37_s28  ;;  %s21_s8 = int_to_ptr.hbm [resolvable:$true] %s20_s8 }
   0x3   :  { %s541_s9 = smov 64   ;;  %s542_s10 = smov 4  }
   0x4   :  { %43 = dma.hbm_to_vmem [thread:$0]  %s36_s26, 1024, %s38_s28, [#allocation5], %s541_s9, %s541_s9, %s542_s10  }
   0x5   :  { %s543_s11 = smov [#allocation2]   ;;  %s50_s15 = sshll.u32 %s614_s5, 4  ;;  %s51_s15 = int_to_ptr.hbm [resolvable:$true] %s50_s15 }
   0x6   :  { %s22_s12 = sshll.u32 %s543_s11, 4  ;;  %s544_s3 = smov [#allocation6]   ;;  %s23_s12 = int_to_ptr.vmem [resolvable:$true] %s22_s12 }
   0x7   :  { %28 = dma.hbm_to_vmem [thread:$0]  %s21_s8, 1024, %s23_s12, [#allocation3], %s541_s9, %s541_s9, %s542_s10  }
   0x8   :  { %s52_s16 = sshll.u32 %s544_s3, 4  ;;  %s53_s16 = int_to_ptr.vmem [resolvable:$true] %s52_s16 }
   0x9   :  { %58 = dma.hbm_to_vmem [thread:$0]  %s51_s15, 1024, %s53_s16, [#allocation5], %s541_s9, %s541_s9, %s542_s10  }
   0xa   :  { %536 = dma.done.wait [#allocation3], 1024  }
   0xb   :  { %537 = vsyncadd [#allocation3], 4294966272 }
   0xc   :  { %538 = dma.done.wait [#allocation5], 2048  }
   0xd   :  { %539 = vsyncadd [#allocation5], 4294965248  ;;  %v437_v0 = vld [vmem:[#allocation2 + $0x38] sm:$0xff]  ;;  %v436_v1 = vld [vmem:[#allocation2 + $0x30] sm:$0xff] }
   0xe   :  { %142 = vmatpush.bf16.msra.mxu0 %v437_v0  ;;  %v445_v2 = vld [vmem:[#allocation4 + $0x38] sm:$0xff]  ;;  %v444_v3 = vld [vmem:[#allocation4 + $0x30] sm:$0xff]  ;;  %v435_v4 = vld [vmem:[#allocation2 + $0x28] sm:$0xff] }
   0xf   :  { %227 = vmatpush.bf16.msra.mxu1 %v445_v2  ;;  %v443_v5 = vld [vmem:[#allocation4 + $0x28] sm:$0xff]  ;;  %v434_v6 = vld [vmem:[#allocation2 + $0x20] sm:$0xff]  ;;  %v433_v8 = vld [vmem:[#allocation2 + $0x18] sm:$0xff] }
  0x10   :  { %v442_v7 = vld [vmem:[#allocation4 + $0x20] sm:$0xff]  ;;  %v441_v9 = vld [vmem:[#allocation4 + $0x18] sm:$0xff]  ;;  %v432_v10 = vld [vmem:[#allocation2 + $0x10] sm:$0xff] }
  0x11   :  { %v440_v11 = vld [vmem:[#allocation4 + $0x10] sm:$0xff]  ;;  %v431_v12 = vld [vmem:[#allocation2 + $0x8] sm:$0xff]  ;;  %v430_v13 = vld [vmem:[#allocation2] sm:$0xff] }
  0x12   :  { %143 = vmatpush.bf16.msra.mxu0 %v436_v1  ;;  %v73_v14 = vld [vmem:[%s609_s0] sm:$0xf]  ;;  %v439_v15 = vld [vmem:[#allocation4 + $0x8] sm:$0xff]  ;;  %v453_v17 = vld [vmem:[#allocation6 + $0x38] sm:$0xff] }
  0x13   :  { %228 = vmatpush.bf16.msra.mxu1 %v444_v3  ;;  %v438_v16 = vld [vmem:[#allocation4] sm:$0xff]  ;;  %312 = vmatpush.bf16.msra.mxu2 %v453_v17  ;;  %v452_v18 = vld [vmem:[#allocation6 + $0x30] sm:$0xff]  ;;  %v451_v19 = vld [vmem:[#allocation6 + $0x28] sm:$0xff] }
  0x14   :  { %v450_v20 = vld [vmem:[#allocation6 + $0x20] sm:$0xff]  ;;  %v449_v21 = vld [vmem:[#allocation6 + $0x18] sm:$0xff]  ;;  %v448_v22 = vld [vmem:[#allocation6 + $0x10] sm:$0xff] }
  0x15   :  { %v459_v23 = vld [vmem:[%s611_s2] ss:$0 sm:$0xff]  ;;  %v447_v29 = vld [vmem:[#allocation6 + $0x8] sm:$0xff] }
  0x16   :  { %144 = vmatpush.bf16.msra.mxu0 %v435_v4  ;;  %v446_v30 = vld [vmem:[#allocation6] sm:$0xff] }
  0x17   :  { %229 = vmatpush.bf16.msra.mxu1 %v443_v5  ;;  %313 = vmatpush.bf16.msra.mxu2 %v452_v18  ;;  %v460_v31 = vld [vmem:[%s613_s4] ss:$0 sm:$0xff] }
  0x18   :  { %v461_v37 = vld [vmem:[%s615_s6] ss:$0 sm:$0xff] }
  0x1a   :  { %145 = vmatpush.bf16.msra.mxu0 %v434_v6 }
  0x1b   :  { %230 = vmatpush.bf16.msra.mxu1 %v442_v7  ;;  %314 = vmatpush.bf16.msra.mxu2 %v451_v19 }
  0x1e   :  { %146 = vmatpush.bf16.msra.mxu0 %v433_v8 }
  0x1f   :  { %231 = vmatpush.bf16.msra.mxu1 %v441_v9  ;;  %315 = vmatpush.bf16.msra.mxu2 %v450_v20 }
  0x22   :  { %147 = vmatpush.bf16.msra.mxu0 %v432_v10 }
  0x23   :  { %232 = vmatpush.bf16.msra.mxu1 %v440_v11  ;;  %316 = vmatpush.bf16.msra.mxu2 %v449_v21 }
  0x26   :  { %148 = vmatpush.bf16.msra.mxu0 %v431_v12 }
  0x27   :  { %233 = vmatpush.bf16.msra.mxu1 %v439_v15  ;;  %317 = vmatpush.bf16.msra.mxu2 %v448_v22 }
  0x2a   :  { %149 = vmatpush.bf16.msra.mxu0 %v430_v13 }
  0x2b   :  { %234 = vmatpush.bf16.msra.mxu1 %v438_v16  ;;  %318 = vmatpush.bf16.msra.mxu2 %v447_v29 }
  0x2d   :  { %150 = vmatmul.bf16.vlgmr.msra.gmra.mxu0 %v73_v14 }
  0x2f   :  { %319 = vmatpush.bf16.msra.mxu2 %v446_v30 }
  0xaa   :  { %v151_v24 = vpop.f32.mrf.mxu0 }
  0xab   :  { %v152_v25 = vadd.f32 %v459_v23, %v151_v24 }
  0xad   :  { %v157_v26 = vmax.f32 %v152_v25, 0.0 }
  0xaf   :  { %v158_v27 = vpack.c.bf16 %v157_v26, %v157_v26 }
  0xb1   :  { %235 = vmatmul.bf16.vlgmr.msra.gmra.mxu1 %v158_v27 }
  0xb2   :  { %v153_v28 = vpop.f32.mrf.mxu0 }
 0x12e   :  { %v236_v32 = vpop.f32.mrf.mxu1 }
 0x12f   :  { %v237_v33 = vadd.f32 %v460_v31, %v236_v32 }
 0x131   :  { %v242_v34 = vmax.f32 %v237_v33, 0.0 }
 0x133   :  { %v243_v35 = vpack.c.bf16 %v242_v34, %v242_v34 }
 0x135   :  { %320 = vmatmul.bf16.vlgmr.msra.gmra.mxu2 %v243_v35 }
 0x136   :  { %v238_v36 = vpop.f32.mrf.mxu1 }
 0x1b8   :  { %v321_v38 = vpop.f32.mrf.mxu2 }
 0x1b9   :  { %v322_v39 = vadd.f32 %v461_v37, %v321_v38 }
 0x1bb   :  { %462 = vtanh.f32 %v322_v39 }
 0x1c0   :  { %v323_v40 = vpop.f32.mrf.mxu2 }
 0x1c1   :  { %v463_v41 = vpop.eup %462 }
 0x1c2   :  { %v326_v42 = vpack.c.bf16 %v463_v41, %v463_v41 }
 0x1c4   :  { %327 = vst [vmem:[%s616_s7] sm:$0xf] %v326_v42 }
 0x1c5   :  { %332 = vsyncpa [#allocation3], 1 }
 0x1c6   :  { %333 = vsyncpa [#allocation5], 1 }

</bundles_post_ra>
